<compile_context>
chip_gen: v6e
topology: v6e:2x2x1
jax: 0.10.0
libtpu: 0.0.40
codegen_flags: <defaults>
</compile_context>

<pallas_src>
import jax
import jax.numpy as jnp
from jax.experimental import pallas as pl
from jax.experimental.pallas import tpu as pltpu


def _round_up(n, m):
    return ((n + m - 1) // m) * m


def _repr_dualhead_kernel(
    x_ref,        # [TM, D_IN]         f32   (cast to bf16 in-kernel)
    w_enc_ref,    # [D_IN, OUT_PAD]    bf16  (w_mu | w_var | 0)
    b_enc_ref,    # [1, OUT_PAD]       f32   (b_mu | b_var | 0)
    w_mid_ref,    # [OUT_PAD, D_MID]   bf16  (w_mid rows 0..R-1, zeros after)
    b_mid_ref,    # [1, D_MID]         f32
    w_head_ref,   # [D_MID, OUT_PAD]   bf16  (0..2R-1 zero | w_h0 | w_h1 | 0)
    b_head_ref,   # [1, OUT_PAD]       f32   (0..2R-1 zero | b_h0 | b_h1 | 0)
    out_ref,      # [TM, OUT_PAD]      f32   packed: repre | repre_var | x0 | x1 | pad
):
    # In-kernel cast: VPU work hidden under the x-tile DMA (kernel is HBM-bound).
    x = x_ref[...].astype(jnp.bfloat16)

    # Fused encoder: one MXU pass over the big D_IN reduction, OUT_PAD lanes wide.
    # Lanes >= 2R are zero (zero weight columns / bias lanes).
    enc = jnp.dot(x, w_enc_ref[...], preferred_element_type=jnp.float32) + b_enc_ref[...]

    # Middle: h = relu(enc @ w_mid_pad + b_mid). Zero rows beyond R make this
    # identical to relu(repre @ w_mid + b_mid); no lane slice of enc needed.
    h = jnp.dot(enc.astype(jnp.bfloat16), w_mid_ref[...],
                preferred_element_type=jnp.float32) + b_mid_ref[...]
    h = jnp.maximum(h, 0.0)

    # Fused heads: one MXU pass; columns 0..2R-1 are zero so the head results
    # land in lanes 2R.. of the packed layout.
    heads = jnp.dot(h.astype(jnp.bfloat16), w_head_ref[...],
                    preferred_element_type=jnp.float32) + b_head_ref[...]

    # Lane-disjoint padded layouts -> packed output is a plain add (no concat),
    # stored as a single unmasked lane-dense vst.
    out_ref[...] = enc + heads


def repr_dualhead_forward(x_nchw, params):
    """x_nchw: [B, C, H, W] float32. Returns (x0, x1, repre, repre_var) in fp32."""
    (w_mu, b_mu, w_var, b_var, w_mid, b_mid, w_h0, b_h0, w_h1, b_h1) = params

    B = x_nchw.shape[0]
    x_flat = x_nchw.reshape(B, -1)          # row-major flatten == torch.flatten(x, 1)
    D_IN = x_flat.shape[1]
    R = w_mu.shape[1]
    D_MID = w_mid.shape[1]
    O0 = w_h0.shape[1]
    O1 = w_h1.shape[1]

    # Packed / lane-padded output layout: [repre | repre_var | x0 | x1 | zero pad].
    OUT_PAD = _round_up(2 * R + O0 + O1, 128)

    # --- weight packing (layout plumbing only; no numerics change) ---
    zcol = lambda n, ref: jnp.zeros((ref.shape[0], n), ref.dtype)
    w_enc = jnp.concatenate(
        [w_mu, w_var, zcol(OUT_PAD - 2 * R, w_mu)], axis=1).astype(jnp.bfloat16)
    b_enc = jnp.concatenate(
        [b_mu, b_var, jnp.zeros((1, OUT_PAD - 2 * R), b_mu.dtype)], axis=1
    ).astype(jnp.float32)

    w_mid_p = jnp.concatenate(
        [w_mid, jnp.zeros((OUT_PAD - R, D_MID), w_mid.dtype)], axis=0
    ).astype(jnp.bfloat16)                                                   # [OUT_PAD, D_MID]
    b_mid_p = b_mid.astype(jnp.float32)                                      # [1, D_MID]

    w_head = jnp.concatenate(
        [jnp.zeros((D_MID, 2 * R), w_h0.dtype), w_h0, w_h1,
         jnp.zeros((D_MID, OUT_PAD - 2 * R - O0 - O1), w_h0.dtype)], axis=1
    ).astype(jnp.bfloat16)                                                   # [D_MID, OUT_PAD]
    b_head = jnp.concatenate(
        [jnp.zeros((1, 2 * R), b_h0.dtype), b_h0, b_h1,
         jnp.zeros((1, OUT_PAD - 2 * R - O0 - O1), b_h0.dtype)], axis=1
    ).astype(jnp.float32)                                                    # [1, OUT_PAD]

    # --- batch tiling (no HBM pad / cast of x) ---
    # Double-buffered fp32 x tile + fp32 out tile must fit comfortably inside
    # v5e's 16 MiB default scoped VMEM -> cap against a ~12 MiB budget.
    bytes_per_row = 2 * 4 * (D_IN + OUT_PAD)
    tm_vmem_cap = max(8, min(1024, ((12 * 1024 * 1024) // bytes_per_row) // 8 * 8))
    B8 = _round_up(B, 8)
    if B8 <= 256:
        TM = min(B8, tm_vmem_cap)
    else:
        # >= 4 grid steps: v7x's two TensorCores both get work, pipeline has depth.
        TM = min(tm_vmem_cap, max(128, _round_up(pl.cdiv(B8, 4), 8)))
    grid = (pl.cdiv(B, TM),)

    def resident(shape):
        # Weights/biases: same block every grid step -> stay VMEM-resident.
        return pl.BlockSpec(shape, lambda i: (0, 0))

    flops = 2 * B * (D_IN * OUT_PAD + OUT_PAD * D_MID + D_MID * OUT_PAD)
    bytes_accessed = (
        x_flat.size * 4                                         # fp32 x read
        + (w_enc.size + w_mid_p.size + w_head.size) * 2         # bf16 weights
        + (b_enc.size + b_mid_p.size + b_head.size) * 4         # fp32 biases
        + B * OUT_PAD * 4                                       # fp32 packed out
    )

    packed = pl.pallas_call(
        _repr_dualhead_kernel,
        out_shape=jax.ShapeDtypeStruct((B, OUT_PAD), jnp.float32),
        grid=grid,
        in_specs=[
            pl.BlockSpec((TM, D_IN), lambda i: (i, 0)),   # x, tiled over batch
            resident(w_enc.shape), resident(b_enc.shape),
            resident(w_mid_p.shape), resident(b_mid_p.shape),
            resident(w_head.shape), resident(b_head.shape),
        ],
        out_specs=pl.BlockSpec((TM, OUT_PAD), lambda i: (i, 0)),
        compiler_params=pltpu.CompilerParams(dimension_semantics=("parallel",)),
        cost_estimate=pl.CostEstimate(
            flops=flops, transcendentals=0, bytes_accessed=bytes_accessed),
    )(x_flat, w_enc, b_enc, w_mid_p, b_mid_p, w_head, b_head)

    # Unpack (fp32). Ragged last grid block never writes beyond row B.
    repre = packed[:B, :R]
    repre_var = packed[:B, R:2 * R]
    x0 = packed[:B, 2 * R:2 * R + O0]
    x1 = packed[:B, 2 * R + O0:2 * R + O0 + O1]
    return x0, x1, repre, repre_var


def init_params(key, d_in, d_repr, d_mid, d_out0, d_out1):
    """Deterministic PyTorch-nn.Linear-style init (uniform +-1/sqrt(fan_in)).
    Weights stored as [in, out] (pre-transposed w.r.t. torch)."""
    ks = jax.random.split(key, 10)

    def lin(kw, kb, fan_in, fan_out):
        bound = 1.0 / jnp.sqrt(fan_in)
        w = jax.random.uniform(kw, (fan_in, fan_out), jnp.float32, -bound, bound)
        b = jax.random.uniform(kb, (1, fan_out), jnp.float32, -bound, bound)
        return w, b

    w_mu, b_mu = lin(ks[0], ks[1], d_in, d_repr)
    w_var, b_var = lin(ks[2], ks[3], d_in, d_repr)
    w_mid, b_mid = lin(ks[4], ks[5], d_repr, d_mid)
    w_h0, b_h0 = lin(ks[6], ks[7], d_mid, d_out0)
    w_h1, b_h1 = lin(ks[8], ks[9], d_mid, d_out1)
    return (w_mu, b_mu, w_var, b_var, w_mid, b_mid, w_h0, b_h0, w_h1, b_h1)


if __name__ == "__main__":
    key = jax.random.PRNGKey(0)
    k_x, k_p = jax.random.split(key)

    # Small shapes consistent with the module's forward.
    B, C, H, W = 2, 4, 16, 16
    D_IN = C * H * W      # 1024
    D_REPR = 32
    D_MID = 32
    D_OUT0 = 8
    D_OUT1 = 4

    x = jax.random.normal(k_x, (B, C, H, W), dtype=jnp.float32)
    params = init_params(k_p, D_IN, D_REPR, D_MID, D_OUT0, D_OUT1)

    x0, x1, repre, repre_var = repr_dualhead_forward(x, params)
    jax.block_until_ready((x0, x1, repre, repre_var))

    # Pure-JAX fp32 reference check (kernel uses bf16 operands, fp32 accumulate).
    (w_mu, b_mu, w_var, b_var, w_mid, b_mid, w_h0, b_h0, w_h1, b_h1) = params
    xf = x.reshape(B, -1)
    repre_ref = xf @ w_mu + b_mu
    var_ref = xf @ w_var + b_var
    h_ref = jnp.maximum(repre_ref @ w_mid + b_mid, 0.0)
    x0_ref = h_ref @ w_h0 + b_h0
    x1_ref = h_ref @ w_h1 + b_h1

    tol = dict(atol=2e-2, rtol=2e-2)
    assert jnp.allclose(x0, x0_ref, **tol)
    assert jnp.allclose(x1, x1_ref, **tol)
    assert jnp.allclose(repre, repre_ref, **tol)
    assert jnp.allclose(repre_var, var_ref, **tol)

    print("KERNEL_OK")
</pallas_src>

<mosaic_0001>
module attributes {stable_mosaic.version = 11 : i64} {
  func.func @_repr_dualhead_kernel(%arg0: i32, %arg1: memref<8x1024xf32, #tpu.memory_space<vmem>>, %arg2: memref<1024x128xbf16, #tpu.memory_space<vmem>>, %arg3: memref<1x128xf32, #tpu.memory_space<vmem>>, %arg4: memref<128x32xbf16, #tpu.memory_space<vmem>>, %arg5: memref<1x32xf32, #tpu.memory_space<vmem>>, %arg6: memref<32x128xbf16, #tpu.memory_space<vmem>>, %arg7: memref<1x128xf32, #tpu.memory_space<vmem>>, %arg8: memref<8x128xf32, #tpu.memory_space<vmem>>) attributes {dimension_semantics = [#tpu.dimension_semantics<parallel>], iteration_bounds = array<i64: 1>, scalar_prefetch = 0 : i64, scratch_operands = 0 : i64, tpu.core_type = #tpu.core_type<tc>, window_params = [{transform_indices = @transform_0, window_bounds = array<i64: 8, 1024>}, {pipeline_mode = #tpu.pipeline_mode<synchronous>, transform_indices = @transform_1, window_bounds = array<i64: 1024, 128>}, {pipeline_mode = #tpu.pipeline_mode<synchronous>, transform_indices = @transform_2, window_bounds = array<i64: 1, 128>}, {pipeline_mode = #tpu.pipeline_mode<synchronous>, transform_indices = @transform_3, window_bounds = array<i64: 128, 32>}, {pipeline_mode = #tpu.pipeline_mode<synchronous>, transform_indices = @transform_4, window_bounds = array<i64: 1, 32>}, {pipeline_mode = #tpu.pipeline_mode<synchronous>, transform_indices = @transform_5, window_bounds = array<i64: 32, 128>}, {pipeline_mode = #tpu.pipeline_mode<synchronous>, transform_indices = @transform_6, window_bounds = array<i64: 1, 128>}, {transform_indices = @transform_7, window_bounds = array<i64: 8, 128>}]} {
    %c0 = arith.constant 0 : index
    %c0_0 = arith.constant 0 : index
    %0 = vector.load %arg1[%c0, %c0_0] : memref<8x1024xf32, #tpu.memory_space<vmem>>, vector<8x1024xf32>
    %1 = arith.truncf %0 : vector<8x1024xf32> to vector<8x1024xbf16>
    %c0_1 = arith.constant 0 : index
    %c0_2 = arith.constant 0 : index
    %2 = vector.load %arg2[%c0_1, %c0_2] : memref<1024x128xbf16, #tpu.memory_space<vmem>>, vector<1024x128xbf16>
    %cst = arith.constant dense<0.000000e+00> : vector<8x128xf32>
    %3 = tpu.matmul %1, %2, %cst {dimension_numbers = #tpu.dot_dimension_numbers<[1], [0], [0], [1], [0, 0, 1, 1], [], []>} : vector<8x1024xbf16>, vector<1024x128xbf16>, vector<8x128xf32> -> vector<8x128xf32>
    %c0_3 = arith.constant 0 : index
    %c0_4 = arith.constant 0 : index
    %4 = vector.load %arg3[%c0_3, %c0_4] : memref<1x128xf32, #tpu.memory_space<vmem>>, vector<1x128xf32>
    %5 = vector.broadcast %4 : vector<1x128xf32> to vector<8x128xf32>
    %6 = arith.addf %3, %5 : vector<8x128xf32>
    %7 = arith.truncf %6 : vector<8x128xf32> to vector<8x128xbf16>
    %c0_5 = arith.constant 0 : index
    %c0_6 = arith.constant 0 : index
    %8 = vector.load %arg4[%c0_5, %c0_6] : memref<128x32xbf16, #tpu.memory_space<vmem>>, vector<128x32xbf16>
    %cst_7 = arith.constant dense<0.000000e+00> : vector<8x32xf32>
    %9 = tpu.matmul %7, %8, %cst_7 {dimension_numbers = #tpu.dot_dimension_numbers<[1], [0], [0], [1], [0, 0, 1, 1], [], []>} : vector<8x128xbf16>, vector<128x32xbf16>, vector<8x32xf32> -> vector<8x32xf32>
    %c0_8 = arith.constant 0 : index
    %c0_9 = arith.constant 0 : index
    %10 = vector.load %arg5[%c0_8, %c0_9] : memref<1x32xf32, #tpu.memory_space<vmem>>, vector<1x32xf32>
    %11 = vector.broadcast %10 : vector<1x32xf32> to vector<8x32xf32>
    %12 = arith.addf %9, %11 : vector<8x32xf32>
    %cst_10 = arith.constant 0.000000e+00 : f32
    %13 = vector.broadcast %cst_10 : f32 to vector<8x32xf32>
    %14 = arith.maximumf %12, %13 : vector<8x32xf32>
    %15 = arith.truncf %14 : vector<8x32xf32> to vector<8x32xbf16>
    %c0_11 = arith.constant 0 : index
    %c0_12 = arith.constant 0 : index
    %16 = vector.load %arg6[%c0_11, %c0_12] : memref<32x128xbf16, #tpu.memory_space<vmem>>, vector<32x128xbf16>
    %cst_13 = arith.constant dense<0.000000e+00> : vector<8x128xf32>
    %17 = tpu.matmul %15, %16, %cst_13 {dimension_numbers = #tpu.dot_dimension_numbers<[1], [0], [0], [1], [0, 0, 1, 1], [], []>} : vector<8x32xbf16>, vector<32x128xbf16>, vector<8x128xf32> -> vector<8x128xf32>
    %c0_14 = arith.constant 0 : index
    %c0_15 = arith.constant 0 : index
    %18 = vector.load %arg7[%c0_14, %c0_15] : memref<1x128xf32, #tpu.memory_space<vmem>>, vector<1x128xf32>
    %19 = vector.broadcast %18 : vector<1x128xf32> to vector<8x128xf32>
    %20 = arith.addf %17, %19 : vector<8x128xf32>
    %21 = arith.addf %6, %20 : vector<8x128xf32>
    %c0_16 = arith.constant 0 : index
    %c0_17 = arith.constant 0 : index
    %22 = vector.load %arg8[%c0_16, %c0_17] : memref<8x128xf32, #tpu.memory_space<vmem>>, vector<8x128xf32>
    tpu.vector_store %arg8[%c0_16, %c0_17], %21 {strides = array<i32>} : memref<8x128xf32, #tpu.memory_space<vmem>>, vector<8x128xf32>,
    return
  }
  func.func @transform_0(%arg0: i32) -> (i32, i32) {
    %c0_i32 = arith.constant 0 : i32
    %c0_i32_0 = arith.constant 0 : i32
    return %arg0, %c0_i32 : i32, i32
  }
  func.func @transform_1(%arg0: i32) -> (i32, i32) {
    %c0_i32 = arith.constant 0 : i32
    %c0_i32_0 = arith.constant 0 : i32
    %c0_i32_1 = arith.constant 0 : i32
    return %c0_i32, %c0_i32_0 : i32, i32
  }
  func.func @transform_2(%arg0: i32) -> (i32, i32) {
    %c0_i32 = arith.constant 0 : i32
    %c0_i32_0 = arith.constant 0 : i32
    %c0_i32_1 = arith.constant 0 : i32
    return %c0_i32, %c0_i32_0 : i32, i32
  }
  func.func @transform_3(%arg0: i32) -> (i32, i32) {
    %c0_i32 = arith.constant 0 : i32
    %c0_i32_0 = arith.constant 0 : i32
    %c0_i32_1 = arith.constant 0 : i32
    return %c0_i32, %c0_i32_0 : i32, i32
  }
  func.func @transform_4(%arg0: i32) -> (i32, i32) {
    %c0_i32 = arith.constant 0 : i32
    %c0_i32_0 = arith.constant 0 : i32
    %c0_i32_1 = arith.constant 0 : i32
    return %c0_i32, %c0_i32_0 : i32, i32
  }
  func.func @transform_5(%arg0: i32) -> (i32, i32) {
    %c0_i32 = arith.constant 0 : i32
    %c0_i32_0 = arith.constant 0 : i32
    %c0_i32_1 = arith.constant 0 : i32
    return %c0_i32, %c0_i32_0 : i32, i32
  }
  func.func @transform_6(%arg0: i32) -> (i32, i32) {
    %c0_i32 = arith.constant 0 : i32
    %c0_i32_0 = arith.constant 0 : i32
    %c0_i32_1 = arith.constant 0 : i32
    return %c0_i32, %c0_i32_0 : i32, i32
  }
  func.func @transform_7(%arg0: i32) -> (i32, i32) {
    %c0_i32 = arith.constant 0 : i32
    %c0_i32_0 = arith.constant 0 : i32
    return %arg0, %c0_i32 : i32, i32
  }
}

</mosaic_0001>

<bundles_post_ra>
// kernel: tpu_custom_call.1
= control target key start
LH: loop header
LB: loop body
LE: loop exit
PB: predicated region body
PF: predicated region fallthrough
CT: control target
= control target key end

     0   :  { %12 = vsyncpa [#allocation3], 0  ;;  %s1498_s0 = inlined_call_operand.vmem [shape: f32[2,1024], index: 0, kind: input, shape index: {}]   ;;  %s1499_s1 = inlined_call_operand.hbm [shape: bf16[1024,128], index: 1, kind: input, shape index: {}]   ;;  %s1500_s2 = inlined_call_operand.vmem [shape: f32[1,128], index: 2, kind: input, shape index: {}]   ;;  %s1501_s3 = inlined_call_operand.vmem [shape: bf16[128,32], index: 3, kind: input, shape index: {}]   ;;  %s1502_s4 = inlined_call_operand.vmem [shape: f32[1,32], index: 4, kind: input, shape index: {}]   ;;  %s1503_s5 = inlined_call_operand.vmem [shape: bf16[32,128], index: 5, kind: input, shape index: {}]   ;;  %s1504_s6 = inlined_call_operand.vmem [shape: f32[1,128], index: 6, kind: input, shape index: {}]   ;;  %s1505_s7 = inlined_call_operand.hbm [shape: f32[2,128], index: 7, kind: output, shape index: {}]  }
   0x1   :  { %13 = vsyncpa [#allocation4], 0  ;;  %s1370_s24 = smov [#allocation2]  }
   0x2   :  { %s21_s25 = sshll.u32 %s1370_s24, 4  ;;  %s22_s25 = int_to_ptr.vmem [resolvable:$true] %s21_s25 }
   0x3   :  { %s1334_s26 = scalar_lea.vmem %s22_s25, 8192  ;;  %p1339_p1 = scmp.lt.s32.totalorder %s22_s25, %s22_s25 }
   0x4   :  { %p1335_p0 = scmp.ne.s32.totalorder %s22_s25, %s1334_s26  ;;  %p1340_p2 = scmp.lt.s32.totalorder %s1334_s26, %s1334_s26 }
   0x6   :  { %p1341_p3 = por %p1340_p2, %p1339_p1 }
   0x8   :  { %p1342_p4 = pnand %p1341_p3, %p1335_p0 }
   0xa   :  { %1345 = shalt.err (!%p1342_p4)
}
   0xb   :  { %s1371_s27 = smov 64   ;;  %s1372_s28 = smov 4  }
   0xc   :  { %27 = dma.hbm_to_vmem [thread:$0]  %s1499_s1, 8192, %s22_s25, [#allocation3], %s1371_s27, %s1371_s27, %s1372_s28  }
   0xd   :  { %1366 = dma.done.wait [#allocation3], 8192  }
   0xe   :  { %1367 = vsyncadd [#allocation3], 4294959104  ;;  %v1240_v0 = vld [vmem:[#allocation2 + $0x78] sm:$0xff]   ;;  %v1244_v4 = vld [vmem:[#allocation2 + $0x70] sm:$0xff]   ;;  %v1373_v24 = vmov 1983009808   ;;  %v65_v26 = vlaneseq }
   0xf   :  { %v1241_v1 = vld [vmem:[#allocation2 + $0xf8] sm:$0xff]   ;;  %1103 = vmatprep.subr.bf16.mxu0 %v1240_v0  ;;  %v1245_v5 = vld [vmem:[#allocation2 + $0xf0] sm:$0xff]   ;;  %v1248_v8 = vld [vmem:[#allocation2 + $0x68] sm:$0xff]   ;;  %v63_v25 = vunpack.c.l.s4 %v1373_v24  ;;  %vm1375_vm0 = vmmov 0   ;;  %vm962_vm1 = vcmask 261120  }
  0x10   :  { %v1242_v2 = vld [vmem:[#allocation2 + $0x38] sm:$0xff]   ;;  %1125 = vmatprep.subr.bf16.mxu1 %v1241_v1  ;;  %v1246_v6 = vld [vmem:[#allocation2 + $0x30] sm:$0xff]   ;;  %v1249_v9 = vld [vmem:[#allocation2 + $0xe8] sm:$0xff]   ;;  %v66_v32 = vshrl.u32 %v65_v26, 7 }
  0x11   :  { %v1243_v3 = vld [vmem:[#allocation2 + $0xb8] sm:$0xff]   ;;  %1104 = vmatpush3.bf16.msra.mxu0 %v1242_v2  ;;  %v1247_v7 = vld [vmem:[#allocation2 + $0xb0] sm:$0xff]   ;;  %v1250_v10 = vld [vmem:[#allocation2 + $0x28] sm:$0xff]   ;;  %v64_v31 = vunpack.c.0.s8 %v63_v25 }
  0x12   :  { %1126 = vmatpush3.bf16.msra.mxu1 %v1243_v3  ;;  %1105 = vmatprep.subr.bf16.mxu0 %v1244_v4  ;;  %v1251_v11 = vld [vmem:[#allocation2 + $0xa8] sm:$0xff]   ;;  %v1252_v12 = vld [vmem:[#allocation2 + $0x60] sm:$0xff]   ;;  %v1256_v16 = vld [vmem:[#allocation2 + $0x58] sm:$0xff]  }
  0x13   :  { %1127 = vmatprep.subr.bf16.mxu1 %v1245_v5  ;;  %v1253_v13 = vld [vmem:[#allocation2 + $0xe0] sm:$0xff]   ;;  %v1257_v17 = vld [vmem:[#allocation2 + $0xd8] sm:$0xff]   ;;  %v1260_v20 = vld [vmem:[#allocation2 + $0x50] sm:$0xff]   ;;  %v1422_v37 = vsub.s32 %v64_v31, %v66_v32 }
  0x14   :  { %v1254_v14 = vld [vmem:[#allocation2 + $0x20] sm:$0xff]   ;;  %v1258_v18 = vld [vmem:[#allocation2 + $0x18] sm:$0xff]   ;;  %v1261_v21 = vld [vmem:[#allocation2 + $0xd0] sm:$0xff]  }
  0x15   :  { %1106 = vmatpush3.bf16.msra.mxu0 %v1246_v6  ;;  %v1255_v15 = vld [vmem:[#allocation2 + $0xa0] sm:$0xff]   ;;  %v1259_v19 = vld [vmem:[#allocation2 + $0x98] sm:$0xff]   ;;  %v1262_v22 = vld [vmem:[#allocation2 + $0x10] sm:$0xff]  }
  0x16   :  { %1128 = vmatpush3.bf16.msra.mxu1 %v1247_v7  ;;  %1107 = vmatprep.subr.bf16.mxu0 %v1248_v8  ;;  %v1263_v23 = vld [vmem:[#allocation2 + $0x90] sm:$0xff]   ;;  %v1264_v27 = vld [vmem:[#allocation2 + $0x48] sm:$0xff]   ;;  %v1268_v33 = vld [vmem:[#allocation2 + $0x40] sm:$0xff]  }
  0x17   :  { %1129 = vmatprep.subr.bf16.mxu1 %v1249_v9  ;;  %v1265_v28 = vld [vmem:[#allocation2 + $0xc8] sm:$0xff]   ;;  %v1269_v34 = vld [vmem:[#allocation2 + $0xc0] sm:$0xff]   ;;  %v1278_v44 = vld [vmem:[#allocation2 + $0x178] sm:$0xff]  }
  0x18   :  { %v1266_v29 = vld [vmem:[#allocation2 + $0x8] sm:$0xff]   ;;  %v1270_v35 = vld [vmem:[#allocation2] sm:$0xff]   ;;  %v1279_v47 = vld [vmem:[#allocation2 + $0x1f8] sm:$0xff]  }
  0x19   :  { %1108 = vmatpush3.bf16.msra.mxu0 %v1250_v10  ;;  %v1267_v30 = vld [vmem:[#allocation2 + $0x88] sm:$0xff]   ;;  %v1271_v36 = vld [vmem:[#allocation2 + $0x80] sm:$0xff]   ;;  %v1280_v50 = vld [vmem:[#allocation2 + $0x138] sm:$0xff]  }
  0x1a   :  { %1130 = vmatpush3.bf16.msra.mxu1 %v1251_v11  ;;  %1109 = vmatprep.subr.bf16.mxu0 %v1252_v12  ;;  %v1272_v38 = vld [vmem:[%s1498_s0] ss:$16 sps:$4 sm:$0xff]   ;;  %v1276_v40 = vld [vmem:[%s1498_s0 + $0x4] ss:$16 sps:$4 sm:$0xff]   ;;  %v1281_v53 = vld [vmem:[#allocation2 + $0x1b8] sm:$0xff]  }
  0x1b   :  { %1131 = vmatprep.subr.bf16.mxu1 %v1253_v13  ;;  %v1274_v39 = vld [vmem:[%s1498_s0 + $0x20] ss:$16 sps:$4 sm:$0xff]   ;;  %v1277_v41 = vld [vmem:[%s1498_s0 + $0x24] ss:$16 sps:$4 sm:$0xff]   ;;  %v68_v42 = vrot.slane %v1272_v38, %v1422_v37  ;;  %v75_v45 = vrot.slane %v1276_v40, %v1422_v37  ;;  %v1286_v62 = vld [vmem:[#allocation2 + $0x168] sm:$0xff]   ;;  %v1374_v40 = vmov 0.0  }
  0x1c   :  { %v82_v43 = vrot.slane %v1274_v39, %v1422_v37  ;;  %v89_v46 = vrot.slane %v1277_v41, %v1422_v37  ;;  %v1282_v56 = vld [vmem:[#allocation2 + $0x170] sm:$0xff]   ;;  %v1287_v63 = vld [vmem:[#allocation2 + $0x1e8] sm:$0xff]   ;;  %v1290_v2 = vld [vmem:[#allocation2 + $0x160] sm:$0xff]  }
  0x1d   :  { %1110 = vmatpush3.bf16.msra.mxu0 %v1254_v14  ;;  %v1283_v59 = vld [vmem:[#allocation2 + $0x1f0] sm:$0xff]   ;;  %v1288_v0 = vld [vmem:[#allocation2 + $0x128] sm:$0xff]   ;;  %v1291_v3 = vld [vmem:[#allocation2 + $0x1e0] sm:$0xff]  }
  0x1e   :  { %1132 = vmatpush3.bf16.msra.mxu1 %v1255_v15  ;;  %1111 = vmatprep.subr.bf16.mxu0 %v1256_v16  ;;  %v91_v48 = vcombine.high %v68_v42, %v82_v43  ;;  %v90_v49 = vcombine.low %v68_v42, %v82_v43  ;;  %v93_v51 = vcombine.high %v75_v45, %v89_v46  ;;  %v1284_v60 = vld [vmem:[#allocation2 + $0x130] sm:$0xff]   ;;  %v1289_v1 = vld [vmem:[#allocation2 + $0x1a8] sm:$0xff]   ;;  %v1292_v4 = vld [vmem:[#allocation2 + $0x120] sm:$0xff]  }
  0x1f   :  { %1133 = vmatprep.subr.bf16.mxu1 %v1257_v17  ;;  %v92_v52 = vcombine.low %v75_v45, %v89_v46  ;;  %v1285_v61 = vld [vmem:[#allocation2 + $0x1b0] sm:$0xff]   ;;  %v1293_v5 = vld [vmem:[#allocation2 + $0x1a0] sm:$0xff]   ;;  %v1294_v6 = vld [vmem:[#allocation2 + $0x158] sm:$0xff]  }
  0x20   :  { %v139_v54 = vpack.c.bf16 %v91_v48, %v91_v48  ;;  %v138_v55 = vpack.c.bf16 %v90_v49, %v90_v49  ;;  %v141_v57 = vpack.c.bf16 %v93_v51, %v93_v51  ;;  %v1295_v7 = vld [vmem:[#allocation2 + $0x1d8] sm:$0xff]   ;;  %v1298_v10 = vld [vmem:[#allocation2 + $0x150] sm:$0xff]   ;;  %v1302_v14 = vld [vmem:[#allocation2 + $0x148] sm:$0xff]  }
  0x21   :  { %1112 = vmatpush3.bf16.msra.mxu0 %v1258_v18  ;;  %v140_v58 = vpack.c.bf16 %v92_v52, %v92_v52  ;;  %v1296_v8 = vld [vmem:[#allocation2 + $0x118] sm:$0xff]   ;;  %v1299_v11 = vld [vmem:[#allocation2 + $0x1d0] sm:$0xff]   ;;  %v1303_v15 = vld [vmem:[#allocation2 + $0x1c8] sm:$0xff]  }
  0x22   :  { %1134 = vmatpush3.bf16.msra.mxu1 %v1259_v19  ;;  %1113 = vmatprep.subr.bf16.mxu0 %v1260_v20  ;;  %v1297_v9 = vld [vmem:[#allocation2 + $0x198] sm:$0xff]   ;;  %v1300_v12 = vld [vmem:[#allocation2 + $0x110] sm:$0xff]   ;;  %v1304_v16 = vld [vmem:[#allocation2 + $0x108] sm:$0xff]  }
  0x23   :  { %1135 = vmatprep.subr.bf16.mxu1 %v1261_v21  ;;  %697 = vmatprep.mubr.bf16.mxu0 %v139_v54  ;;  %v1301_v13 = vld [vmem:[#allocation2 + $0x190] sm:$0xff]   ;;  %v1305_v17 = vld [vmem:[#allocation2 + $0x188] sm:$0xff]   ;;  %v1306_v18 = vld [vmem:[#allocation2 + $0x140] sm:$0xff]  }
  0x24   :  { %737 = vmatprep.mubr.bf16.mxu1 %v141_v57  ;;  %v1307_v19 = vld [vmem:[#allocation2 + $0x1c0] sm:$0xff]   ;;  %v1314_v24 = vld [vmem:[%s1498_s0 + $0xc] ss:$16 sps:$4 sm:$0xff]  }
  0x25   :  { %1114 = vmatpush3.bf16.msra.mxu0 %v1262_v22  ;;  %v1308_v20 = vld [vmem:[#allocation2 + $0x100] sm:$0xff]   ;;  %v1310_v22 = vld [vmem:[%s1498_s0 + $0x8] ss:$16 sps:$4 sm:$0xff]   ;;  %v1315_v25 = vld [vmem:[%s1498_s0 + $0x2c] ss:$16 sps:$4 sm:$0xff]  }
  0x26   :  { %1136 = vmatpush3.bf16.msra.mxu1 %v1263_v23  ;;  %1115 = vmatprep.subr.bf16.mxu0 %v1264_v27  ;;  %v1309_v21 = vld [vmem:[#allocation2 + $0x180] sm:$0xff]   ;;  %v1312_v23 = vld [vmem:[%s1498_s0 + $0x28] ss:$16 sps:$4 sm:$0xff]   ;;  %v104_v26 = vrot.slane %v1310_v22, %v1422_v37 }
  0x27   :  { %1137 = vmatprep.subr.bf16.mxu1 %v1265_v28  ;;  %v118_v27 = vrot.slane %v1312_v23, %v1422_v37  ;;  %v111_v28 = vrot.slane %v1314_v24, %v1422_v37  ;;  %v1316_v39 = vld [vmem:[%s1501_s3 + $0x38] sm:$0xff]   ;;  %v1318_v41 = vld [vmem:[%s1501_s3 + $0x28] sm:$0xff]   ;;  %v1319_v42 = vld [vmem:[%s1501_s3 + $0x20] sm:$0xff]  }
  0x28   :  { %v1320_v43 = vld [vmem:[%s1501_s3 + $0x18] sm:$0xff]   ;;  %v1322_v45 = vld [vmem:[%s1501_s3 + $0x8] sm:$0xff]   ;;  %v1323_v46 = vld [vmem:[%s1501_s3] sm:$0xff]  }
  0x29   :  { %1116 = vmatpush3.bf16.msra.mxu0 %v1266_v29  ;;  %v125_v29 = vrot.slane %v1315_v25, %v1422_v37  ;;  %v126_v31 = vcombine.low %v104_v26, %v118_v27  ;;  %v1317_v37 = vld [vmem:[%s1501_s3 + $0x30] sm:$0xff]   ;;  %v1025_v57 = vld [vmem:[%s1500_s2] ss:$0 sm:$0xff] }
  0x2a   :  { %1138 = vmatpush3.bf16.msra.mxu1 %v1267_v30  ;;  %1117 = vmatprep.subr.bf16.mxu0 %v1268_v33  ;;  %v127_v30 = vcombine.high %v104_v26, %v118_v27 }
  0x2b   :  { %1139 = vmatprep.subr.bf16.mxu1 %v1269_v34  ;;  %v129_v32 = vcombine.high %v111_v28, %v125_v29  ;;  %v128_v33 = vcombine.low %v111_v28, %v125_v29 }
  0x2c   :  { %v143_v34 = vpack.c.bf16 %v127_v30, %v127_v30 }
  0x2d   :  { %1118 = vmatpush3.bf16.msra.mxu0 %v1270_v35  ;;  %v142_v35 = vpack.c.bf16 %v126_v31, %v126_v31  ;;  %v144_v38 = vpack.c.bf16 %v128_v33, %v128_v33 }
  0x2e   :  { %1140 = vmatpush3.bf16.msra.mxu1 %v1271_v36  ;;  %1147 = vmatprep.subr.bf16.mxu0 %v1278_v44  ;;  %v145_v36 = vpack.c.bf16 %v129_v32, %v129_v32  ;;  %v1321_v44 = vld [vmem:[%s1501_s3 + $0x10] sm:$0xff]  }
  0x2f   :  { %1169 = vmatprep.subr.bf16.mxu1 %v1279_v47  ;;  %v1324_v47 = vld [vmem:[%s1503_s5 + $0x8] sm:$0xff]  }
  0x30   :  { %698 = vmatmul.mubr.bf16.vlgmr.msra.gmra.mxu0 %v138_v55 }
  0x31   :  { %738 = vmatmul.mubr.bf16.vlgmr.msra.gmra.mxu1 %v140_v58  ;;  %1148 = vmatpush3.bf16.msra.mxu0 %v1280_v50 }
  0x32   :  { %1170 = vmatpush3.bf16.msra.mxu1 %v1281_v53  ;;  %1149 = vmatprep.subr.bf16.mxu0 %v1282_v56 }
  0x33   :  { %1171 = vmatprep.subr.bf16.mxu1 %v1283_v59  ;;  %777 = vmatprep.mubr.bf16.mxu0 %v143_v34 }
  0x34   :  { %817 = vmatprep.mubr.bf16.mxu1 %v145_v36 }
  0x35   :  { %1150 = vmatpush3.bf16.msra.mxu0 %v1284_v60 }
  0x36   :  { %1172 = vmatpush3.bf16.msra.mxu1 %v1285_v61  ;;  %1151 = vmatprep.subr.bf16.mxu0 %v1286_v62 }
  0x37   :  { %1173 = vmatprep.subr.bf16.mxu1 %v1287_v63 }
  0x39   :  { %1152 = vmatpush3.bf16.msra.mxu0 %v1288_v0 }
  0x3a   :  { %1174 = vmatpush3.bf16.msra.mxu1 %v1289_v1  ;;  %1153 = vmatprep.subr.bf16.mxu0 %v1290_v2 }
  0x3b   :  { %1175 = vmatprep.subr.bf16.mxu1 %v1291_v3 }
  0x3d   :  { %1154 = vmatpush3.bf16.msra.mxu0 %v1292_v4 }
  0x3e   :  { %1176 = vmatpush3.bf16.msra.mxu1 %v1293_v5  ;;  %1155 = vmatprep.subr.bf16.mxu0 %v1294_v6 }
  0x3f   :  { %1177 = vmatprep.subr.bf16.mxu1 %v1295_v7 }
  0x41   :  { %1156 = vmatpush3.bf16.msra.mxu0 %v1296_v8 }
  0x42   :  { %1178 = vmatpush3.bf16.msra.mxu1 %v1297_v9  ;;  %1157 = vmatprep.subr.bf16.mxu0 %v1298_v10  ;;  %v1325_v10 = vld [vmem:[%s1503_s5] sm:$0xff]  }
  0x43   :  { %1179 = vmatprep.subr.bf16.mxu1 %v1299_v11  ;;  %v1090_v11 = vld [vmem:[%s1502_s4] ss:$0 sm:$0xff] }
  0x45   :  { %1158 = vmatpush3.bf16.msra.mxu0 %v1300_v12 }
  0x46   :  { %1180 = vmatpush3.bf16.msra.mxu1 %v1301_v13  ;;  %1159 = vmatprep.subr.bf16.mxu0 %v1302_v14 }
  0x47   :  { %1181 = vmatprep.subr.bf16.mxu1 %v1303_v15 }
  0x49   :  { %1160 = vmatpush3.bf16.msra.mxu0 %v1304_v16 }
  0x4a   :  { %1182 = vmatpush3.bf16.msra.mxu1 %v1305_v17  ;;  %1161 = vmatprep.subr.bf16.mxu0 %v1306_v18 }
  0x4b   :  { %1183 = vmatprep.subr.bf16.mxu1 %v1307_v19  ;;  %v1099_v19 = vld [vmem:[%s1504_s6] ss:$0 sm:$0xff] }
  0x4d   :  { %1162 = vmatpush3.bf16.msra.mxu0 %v1308_v20 }
  0x4e   :  { %1184 = vmatpush3.bf16.msra.mxu1 %v1309_v21  ;;  %1203 = vmatprep.subr.bf16.mxu0 %v1374_v40 }
  0x4f   :  { %1223 = vmatprep.subr.bf16.mxu1 %v1374_v40 }
  0x50   :  { %778 = vmatmul.mubr.bf16.vlgmr.msra.gmra.mxu0 %v142_v35 }
  0x51   :  { %818 = vmatmul.mubr.bf16.vlgmr.msra.gmra.mxu1 %v144_v38  ;;  %1204 = vmatpush3.bf16.msra.mxu0 %v1316_v39 }
  0x52   :  { %1205 = vmatprep.subr.bf16.mxu0 %v1374_v40  ;;  %1219 = vmatprep.mubr.msk.bf16.mxu0 %vm1375_vm0, %v1374_v40 }
  0x53   :  { %1227 = vmatprep.mubr.msk.bf16.mxu1 %vm1375_vm0, %v1374_v40  ;;  %1224 = vmatpush3.bf16.msra.mxu1 %v1324_v47 }
  0x54   :  { %1225 = vmatprep.subr.bf16.mxu1 %v1374_v40 }
  0x55   :  { %1206 = vmatpush3.bf16.msra.mxu0 %v1317_v37 }
  0x56   :  { %1207 = vmatprep.subr.bf16.mxu0 %v1374_v40 }
  0x57   :  { %1226 = vmatpush3.bf16.msra.mxu1 %v1325_v10 }
  0x59   :  { %1208 = vmatpush3.bf16.msra.mxu0 %v1318_v41 }
  0x5a   :  { %1209 = vmatprep.subr.bf16.mxu0 %v1374_v40 }
  0x5d   :  { %1210 = vmatpush3.bf16.msra.mxu0 %v1319_v42 }
  0x5e   :  { %1211 = vmatprep.subr.bf16.mxu0 %v1374_v40 }
  0x61   :  { %1212 = vmatpush3.bf16.msra.mxu0 %v1320_v43 }
  0x62   :  { %1213 = vmatprep.subr.bf16.mxu0 %v1374_v40 }
  0x65   :  { %1214 = vmatpush3.bf16.msra.mxu0 %v1321_v44 }
  0x66   :  { %1215 = vmatprep.subr.bf16.mxu0 %v1374_v40 }
  0x69   :  { %1216 = vmatpush3.bf16.msra.mxu0 %v1322_v45 }
  0x6a   :  { %1217 = vmatprep.subr.bf16.mxu0 %v1374_v40 }
  0x6d   :  { %1218 = vmatpush3.bf16.msra.mxu0 %v1323_v46 }
  0xf0   :  { %v1119_v48 = vpop.f32.mrf.mxu0 }
  0xf1   :  { %v1141_v49 = vpop.f32.mrf.mxu1 }
  0xf2   :  { %v1120_v50 = vpop.f32.mrf.mxu0 }
  0xf3   :  { %v1142_v51 = vpop.f32.mrf.mxu1  ;;  %v1121_v56 = vadd.f32 %v1120_v50, %v1119_v48 }
  0xf4   :  { %v1122_v52 = vpop.f32.mrf.mxu0  ;;  %v1143_v59 = vadd.f32 %v1142_v51, %v1141_v49 }
  0xf5   :  { %v1144_v53 = vpop.f32.mrf.mxu1  ;;  %v700_v58 = vadd.f32 %v1121_v56, %v1025_v57 }
  0xf6   :  { %v1123_v54 = vpop.f32.mrf.mxu0 }
  0xf7   :  { %v1145_v55 = vpop.f32.mrf.mxu1  ;;  %v740_v63 = vadd.f32 %v1143_v59, %v700_v58 }
 0x110   :  { %v1163_v60 = vpop.f32.mrf.mxu0 }
 0x111   :  { %v1185_v61 = vpop.f32.mrf.mxu1 }
 0x112   :  { %v1164_v62 = vpop.f32.mrf.mxu0 }
 0x113   :  { %v1165_v0 = vadd.f32 %v1164_v62, %v1163_v60  ;;  %v1186_v1 = vpop.f32.mrf.mxu1 }
 0x114   :  { %v1166_v2 = vpop.f32.mrf.mxu0  ;;  %v1187_v4 = vadd.f32 %v1186_v1, %v1185_v61 }
 0x115   :  { %v780_v3 = vadd.f32 %v1165_v0, %v740_v63  ;;  %v1188_v5 = vpop.f32.mrf.mxu1 }
 0x116   :  { %v1167_v6 = vpop.f32.mrf.mxu0 }
 0x117   :  { %v820_v7 = vadd.f32 %v1187_v4, %v780_v3  ;;  %v1189_v8 = vpop.f32.mrf.mxu1 }
 0x119   :  { %v825_v9 = vpack.c.bf16 %v820_v7, %v820_v7 }
 0x11b   :  { %1220 = vmatmul.mubr.bf16.vlgmr.msra.gmra.mxu0 %v825_v9 }
 0x1db   :  { %v931_v12 = vpop.f32.mrf.mxu0 }
 0x1dc   :  { %v932_v13 = vadd.f32 %v1090_v11, %v931_v12 }
 0x1dd   :  { %v1221_v14 = vpop.f32.mrf.mxu0 }
 0x1de   :  { %v937_v15 = vmax.f32 %v932_v13, 0.0 }
 0x1df   :  { %v934_v16 = vpop.f32.mrf.mxu0 }
 0x1e0   :  { %v938_v17 = vpack.c.bf16 %v937_v15, %v937_v15 }
 0x1e1   :  { %v1222_v18 = vpop.f32.mrf.mxu0 }
 0x1e2   :  { %1228 = vmatmul.mubr.msk.bf16.vlgmr.msra.gmra.mxu1 %vm962_vm1, %v938_v17 }
 0x2a2   :  { %v1000_v20 = vpop.f32.mrf.mxu1 }
 0x2a3   :  { %v1001_v21 = vadd.f32 %v1099_v19, %v1000_v20 }
 0x2a4   :  { %v1229_v22 = vpop.f32.mrf.mxu1 }
 0x2a5   :  { %v1006_v23 = vadd.f32 %v1001_v21, %v820_v7 }
 0x2a6   :  { %v1003_v24 = vpop.f32.mrf.mxu1 }
 0x2a7   :  { %1007 = vst [vmem:[#allocation5] sm:$0xff] %v1006_v23 }
 0x2a8   :  { %v1230_v25 = vpop.f32.mrf.mxu1 }
 0x2a9   :  { %1012 = vsyncadd [#allocation4], 96  ;;  %s1376_s4 = smov [#allocation5]  }
 0x2aa   :  { %s1013_s5 = sshll.u32 %s1376_s4, 4  ;;  %s1014_s5 = int_to_ptr.vmem [resolvable:$true] %s1013_s5 }
 0x2ab   :  { %s1346_s22 = scalar_lea.vmem %s1014_s5, 32  ;;  %s1350_s0 = scalar_lea.vmem %s1014_s5, 128 }
 0x2ac   :  { %p1347_p5 = scmp.ne.s32.totalorder %s1014_s5, %s1346_s22  ;;  %p1351_p6 = scmp.lt.s32.totalorder %s1014_s5, %s1014_s5 }
 0x2ad   :  { %p1352_p7 = scmp.lt.s32.totalorder %s1350_s0, %s1346_s22 }
 0x2af   :  { %p1353_p8 = por %p1352_p7, %p1351_p6 }
 0x2b1   :  { %p1354_p9 = pnand %p1353_p8, %p1347_p5 }
 0x2b3   :  { %1357 = shalt.err (!%p1354_p9)
}
 0x2b4   :  { %s1377_s6 = smov 32   ;;  %s1378_s23 = smov 2  }
 0x2b5   :  { %1019 = dma.vmem_to_hbm [thread:$0]  %s1014_s5, 32, %s1505_s7, [#allocation4], %s1377_s6, %s1377_s6, %s1378_s23  }
 0x2b6   :  { %1368 = dma.done.wait [#allocation4], 128  }
 0x2b7   :  { %1369 = vsyncadd [#allocation4], 4294967168 }
 0x2b8   :  { %1023 = vsyncpa [#allocation3], 1 }
 0x2b9   :  { %1024 = vsyncpa [#allocation4], 1 }

</bundles_post_ra>
